<compile_context>
chip_gen: v6e
topology: v6e:2x2x1
jax: 0.10.0
libtpu: 0.0.40
codegen_flags: <defaults>
</compile_context>

<pallas_src>
import functools

import jax
import jax.numpy as jnp
from jax import lax
from jax.experimental import pallas as pl
from jax.experimental.pallas import tpu as pltpu

_LANE = 128   # lane width (last dim granularity)
_SUBLANE = 8  # f32 sublane granularity (second-to-last dim)


def _round_up(n, m):
    return ((n + m - 1) // m) * m


def _linear_kernel(x_ref, w_ref, b_ref, o_ref):
    # x_ref: (TM, IN)     true (unpadded) contraction dim
    # w_ref: (OUT_P, IN)  PyTorch layout, OUT zero-padded to 128 lanes
    # b_ref: (1, OUT_P)
    # o_ref: (TM, OUT_P)  lane-dense output -> unmasked stores
    acc = lax.dot_general(
        x_ref[...], w_ref[...],
        dimension_numbers=(((1,), (1,)), ((), ())),   # x @ W^T on the MXU
        preferred_element_type=jnp.float32,
    )
    o_ref[...] = (acc + b_ref[...]).astype(o_ref.dtype)


@functools.partial(jax.jit, static_argnames=("out_features", "batch_tile"))
def _linear_pallas_impl(x, w_p, bias_p, *, out_features, batch_tile=1024):
    """y = x @ weight.T + bias  (torch.nn.Linear semantics).

    x:      [B, IN]      float32 (never lane-padded host-side)
    w_p:    [OUT_P, IN]  float32 (pre-padded once, PyTorch layout, no transpose)
    bias_p: [1, OUT_P]   float32 (pre-padded once)
    """
    B, IN = x.shape
    OUT_P = w_p.shape[0]
    OUT = out_features

    cost = pl.CostEstimate(
        flops=2 * B * IN * OUT,
        transcendentals=0,
        bytes_accessed=4 * (B * IN + OUT_P * IN + OUT_P + B * OUT_P),
    )

    n_tiles = pl.cdiv(B, batch_tile)
    if n_tiles <= 1:
        # Small batch: single grid-less call, everything resident in VMEM.
        out = pl.pallas_call(
            _linear_kernel,
            out_shape=jax.ShapeDtypeStruct((B, OUT_P), x.dtype),
            in_specs=[
                pl.BlockSpec(memory_space=pltpu.MemorySpace.VMEM),
                pl.BlockSpec(memory_space=pltpu.MemorySpace.VMEM),
                pl.BlockSpec(memory_space=pltpu.MemorySpace.VMEM),
            ],
            out_specs=pl.BlockSpec(memory_space=pltpu.MemorySpace.VMEM),
            cost_estimate=cost,
        )(x, w_p, bias_p)
    else:
        # Large batch: right-sized, balanced tiles (even count for v7x's 2 TCs).
        n_tiles = _round_up(n_tiles, 2)
        tm = _round_up(pl.cdiv(B, n_tiles), _SUBLANE)
        b_p = n_tiles * tm
        x_p = jnp.pad(x, ((0, b_p - B), (0, 0)))   # batch-dim pad only (tiny)
        out = pl.pallas_call(
            _linear_kernel,
            out_shape=jax.ShapeDtypeStruct((b_p, OUT_P), x.dtype),
            grid=(n_tiles,),
            in_specs=[
                pl.BlockSpec((tm, IN), lambda i: (i, 0)),
                pl.BlockSpec((OUT_P, IN), lambda i: (0, 0)),   # W resident
                pl.BlockSpec((1, OUT_P), lambda i: (0, 0)),    # bias resident
            ],
            out_specs=pl.BlockSpec((tm, OUT_P), lambda i: (i, 0)),
            compiler_params=pltpu.CompilerParams(
                dimension_semantics=("parallel",)),
            cost_estimate=cost,
        )(x_p, w_p, bias_p)

    # TODO(synk): when a consumer op follows in the same model, return the
    # lane-padded (b_p, OUT_P) slab and let the consumer fuse the de-pad.
    return out[:B, :OUT]


class DemoModelPallas:
    """Pallas equivalent of DemoModel.forward: x -> self.fc(x)."""

    def __init__(self, weight, bias):
        out_f, in_f = weight.shape
        out_p = _round_up(out_f, _LANE)
        # Pre-pad once (hoisted out of the per-call path).
        self._w_p = jnp.pad(weight, ((0, out_p - out_f), (0, 0)))            # (OUT_P, IN)
        self._bias_p = jnp.pad(bias.reshape(1, -1), ((0, 0), (0, out_p - out_f)))  # (1, OUT_P)
        self._out_features = out_f

    def __call__(self, x, *, batch_tile=1024):
        return _linear_pallas_impl(
            x, self._w_p, self._bias_p,
            out_features=self._out_features, batch_tile=batch_tile)


if __name__ == "__main__":
    key = jax.random.PRNGKey(0)
    k_x, k_w, k_b, k_x2 = jax.random.split(key, 4)

    B, IN, OUT = 8, 10, 10

    # Deterministic init mimicking nn.Linear's uniform(-1/sqrt(IN), 1/sqrt(IN)).
    bound = 1.0 / (IN ** 0.5)
    weight = jax.random.uniform(k_w, (OUT, IN), jnp.float32, -bound, bound)
    bias = jax.random.uniform(k_b, (OUT,), jnp.float32, -bound, bound)

    model = DemoModelPallas(weight, bias)

    # Small-batch path (grid-less, everything resident in VMEM).
    x = jax.random.normal(k_x, (B, IN), jnp.float32)
    y = model(x)
    jax.block_until_ready(y)
    y_ref = x @ weight.T + bias
    assert y.shape == (B, OUT)
    assert jnp.allclose(y, y_ref, atol=1e-5, rtol=1e-5)

    # Exercise the right-sized, batch-tiled ("parallel") path as well.
    B2 = 600
    x2 = jax.random.normal(k_x2, (B2, IN), jnp.float32)
    y2 = model(x2, batch_tile=256)   # -> 4 balanced tiles of 152 rows
    jax.block_until_ready(y2)
    y2_ref = x2 @ weight.T + bias
    assert y2.shape == (B2, OUT)
    assert jnp.allclose(y2, y2_ref, atol=1e-5, rtol=1e-5)

    print("KERNEL_OK")
</pallas_src>

<mosaic_0001>
module attributes {stable_mosaic.version = 11 : i64} {
  func.func @_linear_kernel(%arg0: memref<8x10xf32, #tpu.memory_space<vmem>>, %arg1: memref<128x10xf32, #tpu.memory_space<vmem>>, %arg2: memref<1x128xf32, #tpu.memory_space<vmem>>, %arg3: memref<8x128xf32, #tpu.memory_space<vmem>>) attributes {dimension_semantics = [], scalar_prefetch = 0 : i64, scratch_operands = 0 : i64, tpu.core_type = #tpu.core_type<tc>} {
    %c0 = arith.constant 0 : index
    %c0_0 = arith.constant 0 : index
    %0 = vector.load %arg0[%c0, %c0_0] : memref<8x10xf32, #tpu.memory_space<vmem>>, vector<8x10xf32>
    %c0_1 = arith.constant 0 : index
    %c0_2 = arith.constant 0 : index
    %1 = vector.load %arg1[%c0_1, %c0_2] : memref<128x10xf32, #tpu.memory_space<vmem>>, vector<128x10xf32>
    %cst = arith.constant dense<0.000000e+00> : vector<8x128xf32>
    %2 = tpu.matmul %0, %1, %cst {dimension_numbers = #tpu.dot_dimension_numbers<[1], [1], [0], [0], [0, 0, 1, 0], [], []>} : vector<8x10xf32>, vector<128x10xf32>, vector<8x128xf32> -> vector<8x128xf32>
    %c0_3 = arith.constant 0 : index
    %c0_4 = arith.constant 0 : index
    %3 = vector.load %arg2[%c0_3, %c0_4] : memref<1x128xf32, #tpu.memory_space<vmem>>, vector<1x128xf32>
    %4 = vector.broadcast %3 : vector<1x128xf32> to vector<8x128xf32>
    %5 = arith.addf %2, %4 : vector<8x128xf32>
    %c0_5 = arith.constant 0 : index
    %c0_6 = arith.constant 0 : index
    %6 = vector.load %arg3[%c0_5, %c0_6] : memref<8x128xf32, #tpu.memory_space<vmem>>, vector<8x128xf32>
    tpu.vector_store %arg3[%c0_5, %c0_6], %5 {strides = array<i32>} : memref<8x128xf32, #tpu.memory_space<vmem>>, vector<8x128xf32>,
    return
  }
}

</mosaic_0001>

<bundles_post_ra>
// kernel: _linear_pallas_impl.1
= control target key start
LH: loop header
LB: loop body
LE: loop exit
PB: predicated region body
PF: predicated region fallthrough
CT: control target
= control target key end

     0   :  { %vm39_vm0 = vcmask 80896   ;;  %v271_v1 = vmov 0.0   ;;  %vm272_vm1 = vmmov 0   ;;  %s368_s0 = inlined_call_operand.vmem [shape: f32[8,10], index: 0, kind: input, shape index: {}]   ;;  %s369_s1 = inlined_call_operand.vmem [shape: f32[128,10], index: 1, kind: input, shape index: {}]   ;;  %s370_s2 = inlined_call_operand.vmem [shape: f32[1,128], index: 2, kind: input, shape index: {}]   ;;  %s371_s3 = inlined_call_operand.hbm [shape: f32[8,128], index: 3, kind: output, shape index: {}]  }
   0x1   :  { %v31_v0 = vld [vmem:[%s369_s1 + $0x78] sm:$0xff]  ;;  %211 = vmatprep.subr.mxu0 %v271_v1  ;;  %243 = vmatprep.mubr.msk.f32.mxu0 %vm272_vm1, %v271_v1  ;;  %v30_v2 = vld [vmem:[%s369_s1 + $0x70] sm:$0xff] }
   0x2   :  { %212 = vmatpush3.xpose.msk.msra.mxu0 %vm39_vm0, %v31_v0 }
   0x3   :  { %213 = vmatprep.subr.mxu0 %v271_v1 }
   0x6   :  { %214 = vmatpush3.xpose.msk.msra.mxu0 %vm39_vm0, %v30_v2 }
   0x7   :  { %8 = vsyncpa [#allocation3], 0  ;;  %215 = vmatprep.subr.mxu0 %v271_v1  ;;  %v29_v3 = vld [vmem:[%s369_s1 + $0x68] sm:$0xff]  ;;  %v28_v4 = vld [vmem:[%s369_s1 + $0x60] sm:$0xff]  ;;  %s273_s21 = smov [#allocation2]  }
   0x8   :  { %v27_v5 = vld [vmem:[%s369_s1 + $0x58] sm:$0xff]  ;;  %v26_v6 = vld [vmem:[%s369_s1 + $0x50] sm:$0xff]  ;;  %v25_v7 = vld [vmem:[%s369_s1 + $0x48] sm:$0xff]  ;;  %s168_s22 = sshll.u32 %s273_s21, 4  ;;  %s169_s22 = int_to_ptr.vmem [resolvable:$true] %s168_s22 }
   0x9   :  { %v24_v8 = vld [vmem:[%s369_s1 + $0x40] sm:$0xff]  ;;  %v23_v9 = vld [vmem:[%s369_s1 + $0x38] sm:$0xff]  ;;  %v22_v10 = vld [vmem:[%s369_s1 + $0x30] sm:$0xff]  ;;  %p254_p1 = scmp.lt.s32.totalorder %s169_s22, %s169_s22 }
   0xa   :  { %216 = vmatpush3.xpose.msk.msra.mxu0 %vm39_vm0, %v29_v3  ;;  %v21_v11 = vld [vmem:[%s369_s1 + $0x28] sm:$0xff]  ;;  %v20_v12 = vld [vmem:[%s369_s1 + $0x20] sm:$0xff]  ;;  %v19_v13 = vld [vmem:[%s369_s1 + $0x18] sm:$0xff] }
   0xb   :  { %217 = vmatprep.subr.mxu0 %v271_v1  ;;  %v18_v14 = vld [vmem:[%s369_s1 + $0x10] sm:$0xff]  ;;  %v17_v15 = vld [vmem:[%s369_s1 + $0x8] sm:$0xff]  ;;  %v16_v16 = vld [vmem:[%s369_s1] sm:$0xff]  ;;  %s249_s1 = scalar_lea.vmem %s169_s22, 128 }
   0xc   :  { %v15_v17 = vld [vmem:[%s368_s0] sm:$0xff]  ;;  %p250_p0 = scmp.ne.s32.totalorder %s169_s22, %s249_s1  ;;  %p255_p2 = scmp.lt.s32.totalorder %s249_s1, %s249_s1 }
   0xd   :  { %v176_v18 = vld [vmem:[%s370_s2] ss:$0 sm:$0xff] }
   0xe   :  { %218 = vmatpush3.xpose.msk.msra.mxu0 %vm39_vm0, %v28_v4  ;;  %p256_p3 = por %p255_p2, %p254_p1 }
   0xf   :  { %219 = vmatprep.subr.mxu0 %v271_v1 }
  0x10   :  { %p257_p4 = pnand %p256_p3, %p250_p0 }
  0x12   :  { %220 = vmatpush3.xpose.msk.msra.mxu0 %vm39_vm0, %v27_v5 }
  0x13   :  { %221 = vmatprep.subr.mxu0 %v271_v1 }
  0x16   :  { %222 = vmatpush3.xpose.msk.msra.mxu0 %vm39_vm0, %v26_v6 }
  0x17   :  { %223 = vmatprep.subr.mxu0 %v271_v1 }
  0x1a   :  { %224 = vmatpush3.xpose.msk.msra.mxu0 %vm39_vm0, %v25_v7 }
  0x1b   :  { %225 = vmatprep.subr.mxu0 %v271_v1 }
  0x1e   :  { %226 = vmatpush3.xpose.msk.msra.mxu0 %vm39_vm0, %v24_v8 }
  0x1f   :  { %227 = vmatprep.subr.mxu0 %v271_v1 }
  0x22   :  { %228 = vmatpush3.xpose.msk.msra.mxu0 %vm39_vm0, %v23_v9 }
  0x23   :  { %229 = vmatprep.subr.mxu0 %v271_v1 }
  0x26   :  { %230 = vmatpush3.xpose.msk.msra.mxu0 %vm39_vm0, %v22_v10 }
  0x27   :  { %231 = vmatprep.subr.mxu0 %v271_v1 }
  0x2a   :  { %232 = vmatpush3.xpose.msk.msra.mxu0 %vm39_vm0, %v21_v11 }
  0x2b   :  { %233 = vmatprep.subr.mxu0 %v271_v1 }
  0x2e   :  { %234 = vmatpush3.xpose.msk.msra.mxu0 %vm39_vm0, %v20_v12 }
  0x2f   :  { %235 = vmatprep.subr.mxu0 %v271_v1 }
  0x32   :  { %236 = vmatpush3.xpose.msk.msra.mxu0 %vm39_vm0, %v19_v13 }
  0x33   :  { %237 = vmatprep.subr.mxu0 %v271_v1 }
  0x36   :  { %238 = vmatpush3.xpose.msk.msra.mxu0 %vm39_vm0, %v18_v14 }
  0x37   :  { %239 = vmatprep.subr.mxu0 %v271_v1 }
  0x3a   :  { %240 = vmatpush3.xpose.msk.msra.mxu0 %vm39_vm0, %v17_v15 }
  0x3b   :  { %241 = vmatprep.subr.mxu0 %v271_v1 }
  0x3e   :  { %242 = vmatpush3.xpose.msk.msra.mxu0 %vm39_vm0, %v16_v16 }
  0x41   :  { %244 = vmatmul.mubr.msk.f32.vlgmr.msra.gmra.mxu0 %vm39_vm0, %v15_v17 }
 0x101   :  { %v157_v19 = vpop.f32.mrf.mxu0 }
 0x102   :  { %v158_v20 = vadd.f32 %v176_v18, %v157_v19 }
 0x103   :  { %v245_v21 = vpop.f32.mrf.mxu0 }
 0x104   :  { %161 = vst [vmem:[#allocation2] sm:$0xff] %v158_v20 }
 0x105   :  { %260 = shalt.err (!%p257_p4)
}
 0x106   :  { %171 = dma.vmem_to_hbm [thread:$0]  %s169_s22, 128, %s371_s3, [#allocation3]  }
 0x107   :  { %269 = dma.done.wait [#allocation3], 128  }
 0x108   :  { %270 = vsyncadd [#allocation3], 4294967168 }
 0x109   :  { %175 = vsyncpa [#allocation3], 1 }

</bundles_post_ra>
